<compile_context>
chip_gen: v6e
topology: v6e:2x2x1
jax: 0.10.0
libtpu: 0.0.40
codegen_flags: <defaults>
</compile_context>

<pallas_src>
import functools
import math

import jax
import jax.numpy as jnp
from jax.experimental import pallas as pl
from jax.experimental.pallas import tpu as pltpu

# Hidden widths (module-level constants in DQNetwork.py). 128 fills the full
# MXU lane width on every generation.
NEURON_FC1 = 128
NEURON_FC2 = 128

_LANE = 128        # lane (last-dim) width used for the hidden / padded fc3 dims
_SUBLANE = 8       # sublane granularity for the batch tile
_TILE_B_MAX = 2048 # per-tile VMEM (incl. lane padding) ~5 MiB -> safe on v5e's 16 MiB default


def _round_up(x, m):
    return ((x + m - 1) // m) * m


def qnetwork_kernel(action_size, x_ref, w1_ref, b1_ref, w2_ref, b2_ref,
                    w3_ref, b3_ref, out_ref):
    """Fused MLP on one batch tile: relu(x@W1+b1) -> relu(.@W2+b2) -> .@W3+b3.

    x arrives f32 (narrow, state_size lanes) and is cast to bf16 in-kernel;
    weights are bf16 (native MXU path); accumulation, bias add and ReLU are
    f32; only the real `action_size` output columns are stored.
    """
    x = x_ref[...].astype(jnp.bfloat16)                              # (TILE_B, S)
    h1 = jnp.dot(x, w1_ref[...], preferred_element_type=jnp.float32) + b1_ref[...]
    h1 = jnp.maximum(h1, 0.0).astype(jnp.bfloat16)
    h2 = jnp.dot(h1, w2_ref[...], preferred_element_type=jnp.float32) + b2_ref[...]
    h2 = jnp.maximum(h2, 0.0).astype(jnp.bfloat16)
    out = jnp.dot(h2, w3_ref[...], preferred_element_type=jnp.float32) + b3_ref[...]
    out_ref[...] = out[:, :action_size].astype(out_ref.dtype)        # narrow store


def prepare_qnetwork_params(params):
    """One-time preprocessing (do at init, reuse every forward call).

    Pads fc3's output dim to 128 lanes and casts matmul weights to bf16;
    biases stay f32 (added after the f32 accumulation).
    """
    w1, b1, w2, b2, w3, b3 = params
    state_size = w1.shape[0]
    action_size = w3.shape[1]
    n3_pad = _round_up(action_size, _LANE)
    return {
        "state_size": state_size,
        "action_size": action_size,
        "w1": w1.astype(jnp.bfloat16),                                    # (S, 128)
        "b1": b1.astype(jnp.float32),                                     # (1, 128)
        "w2": w2.astype(jnp.bfloat16),                                    # (128, 128)
        "b2": b2.astype(jnp.float32),                                     # (1, 128)
        "w3": jnp.pad(w3, ((0, 0), (0, n3_pad - action_size))).astype(jnp.bfloat16),
        "b3": jnp.pad(b3, ((0, 0), (0, n3_pad - action_size))).astype(jnp.float32),
    }


def qnetwork_forward(state, prepped):
    """Grids over the batch and calls the fused Pallas kernel."""
    batch, state_size = state.shape
    assert state_size == prepped["state_size"]
    action_size = prepped["action_size"]

    # Balanced batch tiling: <= _TILE_B_MAX rows per tile, at most 7 pad rows
    # per tile, and >= 2 grid steps when the batch allows (so v7x's two
    # TensorCores both get work via the "parallel" grid axis).
    num_tiles = pl.cdiv(batch, _TILE_B_MAX)
    if batch >= 2 * _SUBLANE:
        num_tiles = max(num_tiles, 2)
    num_tiles = max(num_tiles, 1)
    tile_b = _round_up(pl.cdiv(batch, num_tiles), _SUBLANE)
    padded_b = tile_b * num_tiles

    x = state if padded_b == batch else jnp.pad(state, ((0, padded_b - batch), (0, 0)))

    w1, b1 = prepped["w1"], prepped["b1"]
    w2, b2 = prepped["w2"], prepped["b2"]
    w3, b3 = prepped["w3"], prepped["b3"]

    state_spec_kwargs = {}
    if num_tiles >= 3:
        # Deeper input buffering hides the exposed HBM read of the state stream
        # when the grid is long enough for it to matter.
        state_spec_kwargs["pipeline_mode"] = pl.Buffered(3)
    state_spec = pl.BlockSpec((tile_b, state_size), lambda i: (i, 0), **state_spec_kwargs)
    out_spec = pl.BlockSpec((tile_b, action_size), lambda i: (i, 0))

    def _resident(arr):
        # Full-array block + constant index map: fetched once, reused (no
        # re-DMA) across every batch-grid step.
        return pl.BlockSpec(arr.shape, lambda i: (0, 0))

    h1_units = w1.shape[1]
    h2_units = w2.shape[1]
    n3 = w3.shape[1]
    flops = 2 * padded_b * (state_size * h1_units + h1_units * h2_units + h2_units * n3)
    bytes_accessed = (
        x.size * 4
        + (w1.size + w2.size + w3.size) * 2
        + (b1.size + b2.size + b3.size) * 4
        + padded_b * action_size * 4
    )

    out = pl.pallas_call(
        functools.partial(qnetwork_kernel, action_size),
        out_shape=jax.ShapeDtypeStruct((padded_b, action_size), jnp.float32),
        grid=(num_tiles,),
        in_specs=[
            state_spec,
            _resident(w1), _resident(b1),
            _resident(w2), _resident(b2),
            _resident(w3), _resident(b3),
        ],
        out_specs=out_spec,
        compiler_params=pltpu.CompilerParams(dimension_semantics=("parallel",)),
        cost_estimate=pl.CostEstimate(
            flops=flops, transcendentals=0, bytes_accessed=bytes_accessed
        ),
    )(x, w1, b1, w2, b2, w3, b3)

    return out[:batch] if padded_b != batch else out


def init_linear_params(key, in_features, out_features):
    """PyTorch nn.Linear default init: U(-1/sqrt(fan_in), 1/sqrt(fan_in)).

    Weight is returned already transposed to (in_features, out_features).
    """
    kw, kb = jax.random.split(key)
    bound = 1.0 / math.sqrt(in_features)
    w = jax.random.uniform(
        kw, (in_features, out_features), dtype=jnp.float32, minval=-bound, maxval=bound
    )
    b = jax.random.uniform(
        kb, (1, out_features), dtype=jnp.float32, minval=-bound, maxval=bound
    )
    return w, b


def init_qnetwork_params(key, state_size, action_size):
    k1, k2, k3 = jax.random.split(key, 3)
    w1, b1 = init_linear_params(k1, state_size, NEURON_FC1)
    w2, b2 = init_linear_params(k2, NEURON_FC1, NEURON_FC2)
    w3, b3 = init_linear_params(k3, NEURON_FC2, action_size)
    return (w1, b1, w2, b2, w3, b3)


def qnetwork_reference(state, params):
    """Pure-JAX reference mirroring the kernel's bf16-operand / f32-accumulate path."""
    w1, b1, w2, b2, w3, b3 = params
    x = state.astype(jnp.bfloat16)
    h1 = jnp.maximum(
        jnp.dot(x, w1.astype(jnp.bfloat16), preferred_element_type=jnp.float32) + b1, 0.0
    ).astype(jnp.bfloat16)
    h2 = jnp.maximum(
        jnp.dot(h1, w2.astype(jnp.bfloat16), preferred_element_type=jnp.float32) + b2, 0.0
    ).astype(jnp.bfloat16)
    return jnp.dot(h2, w3.astype(jnp.bfloat16), preferred_element_type=jnp.float32) + b3


if __name__ == "__main__":
    state_size = 8
    action_size = 4

    key = jax.random.PRNGKey(0)
    k_params, k_state1, k_state2 = jax.random.split(key, 3)

    params = init_qnetwork_params(k_params, state_size, action_size)
    prepped = prepare_qnetwork_params(params)   # one-time; hoisted out of forward

    # Case 1: single-tile grid, batch not a sublane multiple (exercises padding).
    state_a = jax.random.normal(k_state1, (10, state_size), dtype=jnp.float32)
    out_a = jax.block_until_ready(qnetwork_forward(state_a, prepped))
    ref_a = qnetwork_reference(state_a, params)
    assert out_a.shape == (10, action_size)
    assert jnp.allclose(out_a, ref_a, atol=2e-2, rtol=2e-2), float(jnp.max(jnp.abs(out_a - ref_a)))

    # Case 2: multi-tile grid (>=2 steps -> both v7x TensorCores), padded tiles.
    state_b = jax.random.normal(k_state2, (40, state_size), dtype=jnp.float32)
    out_b = jax.block_until_ready(qnetwork_forward(state_b, prepped))
    ref_b = qnetwork_reference(state_b, params)
    assert out_b.shape == (40, action_size)
    assert jnp.allclose(out_b, ref_b, atol=2e-2, rtol=2e-2), float(jnp.max(jnp.abs(out_b - ref_b)))

    print("KERNEL_OK")
</pallas_src>

<mosaic_0001>
module attributes {stable_mosaic.version = 11 : i64} {
  func.func @qnetwork_kernel(%arg0: i32, %arg1: memref<16x8xf32, #tpu.memory_space<vmem>>, %arg2: memref<8x128xbf16, #tpu.memory_space<vmem>>, %arg3: memref<1x128xf32, #tpu.memory_space<vmem>>, %arg4: memref<128x128xbf16, #tpu.memory_space<vmem>>, %arg5: memref<1x128xf32, #tpu.memory_space<vmem>>, %arg6: memref<128x128xbf16, #tpu.memory_space<vmem>>, %arg7: memref<1x128xf32, #tpu.memory_space<vmem>>, %arg8: memref<16x4xf32, #tpu.memory_space<vmem>>) attributes {dimension_semantics = [#tpu.dimension_semantics<parallel>], iteration_bounds = array<i64: 1>, scalar_prefetch = 0 : i64, scratch_operands = 0 : i64, tpu.core_type = #tpu.core_type<tc>, window_params = [{transform_indices = @transform_0, window_bounds = array<i64: 16, 8>}, {pipeline_mode = #tpu.pipeline_mode<synchronous>, transform_indices = @transform_1, window_bounds = array<i64: 8, 128>}, {pipeline_mode = #tpu.pipeline_mode<synchronous>, transform_indices = @transform_2, window_bounds = array<i64: 1, 128>}, {pipeline_mode = #tpu.pipeline_mode<synchronous>, transform_indices = @transform_3, window_bounds = array<i64: 128, 128>}, {pipeline_mode = #tpu.pipeline_mode<synchronous>, transform_indices = @transform_4, window_bounds = array<i64: 1, 128>}, {pipeline_mode = #tpu.pipeline_mode<synchronous>, transform_indices = @transform_5, window_bounds = array<i64: 128, 128>}, {pipeline_mode = #tpu.pipeline_mode<synchronous>, transform_indices = @transform_6, window_bounds = array<i64: 1, 128>}, {transform_indices = @transform_7, window_bounds = array<i64: 16, 4>}]} {
    %c0 = arith.constant 0 : index
    %c0_0 = arith.constant 0 : index
    %0 = vector.load %arg1[%c0, %c0_0] : memref<16x8xf32, #tpu.memory_space<vmem>>, vector<16x8xf32>
    %1 = arith.truncf %0 : vector<16x8xf32> to vector<16x8xbf16>
    %c0_1 = arith.constant 0 : index
    %c0_2 = arith.constant 0 : index
    %2 = vector.load %arg2[%c0_1, %c0_2] : memref<8x128xbf16, #tpu.memory_space<vmem>>, vector<8x128xbf16>
    %cst = arith.constant dense<0.000000e+00> : vector<16x128xf32>
    %3 = tpu.matmul %1, %2, %cst {dimension_numbers = #tpu.dot_dimension_numbers<[1], [0], [0], [1], [0, 0, 1, 1], [], []>} : vector<16x8xbf16>, vector<8x128xbf16>, vector<16x128xf32> -> vector<16x128xf32>
    %c0_3 = arith.constant 0 : index
    %c0_4 = arith.constant 0 : index
    %4 = vector.load %arg3[%c0_3, %c0_4] : memref<1x128xf32, #tpu.memory_space<vmem>>, vector<1x128xf32>
    %5 = vector.broadcast %4 : vector<1x128xf32> to vector<16x128xf32>
    %6 = arith.addf %3, %5 : vector<16x128xf32>
    %cst_5 = arith.constant 0.000000e+00 : f32
    %7 = vector.broadcast %cst_5 : f32 to vector<16x128xf32>
    %8 = arith.maximumf %6, %7 : vector<16x128xf32>
    %9 = arith.truncf %8 : vector<16x128xf32> to vector<16x128xbf16>
    %c0_6 = arith.constant 0 : index
    %c0_7 = arith.constant 0 : index
    %10 = vector.load %arg4[%c0_6, %c0_7] : memref<128x128xbf16, #tpu.memory_space<vmem>>, vector<128x128xbf16>
    %cst_8 = arith.constant dense<0.000000e+00> : vector<16x128xf32>
    %11 = tpu.matmul %9, %10, %cst_8 {dimension_numbers = #tpu.dot_dimension_numbers<[1], [0], [0], [1], [0, 0, 1, 1], [], []>} : vector<16x128xbf16>, vector<128x128xbf16>, vector<16x128xf32> -> vector<16x128xf32>
    %c0_9 = arith.constant 0 : index
    %c0_10 = arith.constant 0 : index
    %12 = vector.load %arg5[%c0_9, %c0_10] : memref<1x128xf32, #tpu.memory_space<vmem>>, vector<1x128xf32>
    %13 = vector.broadcast %12 : vector<1x128xf32> to vector<16x128xf32>
    %14 = arith.addf %11, %13 : vector<16x128xf32>
    %cst_11 = arith.constant 0.000000e+00 : f32
    %15 = vector.broadcast %cst_11 : f32 to vector<16x128xf32>
    %16 = arith.maximumf %14, %15 : vector<16x128xf32>
    %17 = arith.truncf %16 : vector<16x128xf32> to vector<16x128xbf16>
    %c0_12 = arith.constant 0 : index
    %c0_13 = arith.constant 0 : index
    %18 = vector.load %arg6[%c0_12, %c0_13] : memref<128x128xbf16, #tpu.memory_space<vmem>>, vector<128x128xbf16>
    %cst_14 = arith.constant dense<0.000000e+00> : vector<16x128xf32>
    %19 = tpu.matmul %17, %18, %cst_14 {dimension_numbers = #tpu.dot_dimension_numbers<[1], [0], [0], [1], [0, 0, 1, 1], [], []>} : vector<16x128xbf16>, vector<128x128xbf16>, vector<16x128xf32> -> vector<16x128xf32>
    %c0_15 = arith.constant 0 : index
    %c0_16 = arith.constant 0 : index
    %20 = vector.load %arg7[%c0_15, %c0_16] : memref<1x128xf32, #tpu.memory_space<vmem>>, vector<1x128xf32>
    %21 = vector.broadcast %20 : vector<1x128xf32> to vector<16x128xf32>
    %22 = arith.addf %19, %21 : vector<16x128xf32>
    %23 = vector.extract_strided_slice %22 {offsets = [0, 0], sizes = [16, 4], strides = [1, 1]} : vector<16x128xf32> to vector<16x4xf32>
    %c0_17 = arith.constant 0 : index
    %c0_18 = arith.constant 0 : index
    %24 = vector.load %arg8[%c0_17, %c0_18] : memref<16x4xf32, #tpu.memory_space<vmem>>, vector<16x4xf32>
    tpu.vector_store %arg8[%c0_17, %c0_18], %23 {strides = array<i32>} : memref<16x4xf32, #tpu.memory_space<vmem>>, vector<16x4xf32>,
    return
  }
  func.func @transform_0(%arg0: i32) -> (i32, i32) {
    %c0_i32 = arith.constant 0 : i32
    %c0_i32_0 = arith.constant 0 : i32
    return %arg0, %c0_i32 : i32, i32
  }
  func.func @transform_1(%arg0: i32) -> (i32, i32) {
    %c0_i32 = arith.constant 0 : i32
    %c0_i32_0 = arith.constant 0 : i32
    %c0_i32_1 = arith.constant 0 : i32
    return %c0_i32, %c0_i32_0 : i32, i32
  }
  func.func @transform_2(%arg0: i32) -> (i32, i32) {
    %c0_i32 = arith.constant 0 : i32
    %c0_i32_0 = arith.constant 0 : i32
    %c0_i32_1 = arith.constant 0 : i32
    return %c0_i32, %c0_i32_0 : i32, i32
  }
  func.func @transform_3(%arg0: i32) -> (i32, i32) {
    %c0_i32 = arith.constant 0 : i32
    %c0_i32_0 = arith.constant 0 : i32
    %c0_i32_1 = arith.constant 0 : i32
    return %c0_i32, %c0_i32_0 : i32, i32
  }
  func.func @transform_4(%arg0: i32) -> (i32, i32) {
    %c0_i32 = arith.constant 0 : i32
    %c0_i32_0 = arith.constant 0 : i32
    %c0_i32_1 = arith.constant 0 : i32
    return %c0_i32, %c0_i32_0 : i32, i32
  }
  func.func @transform_5(%arg0: i32) -> (i32, i32) {
    %c0_i32 = arith.constant 0 : i32
    %c0_i32_0 = arith.constant 0 : i32
    %c0_i32_1 = arith.constant 0 : i32
    return %c0_i32, %c0_i32_0 : i32, i32
  }
  func.func @transform_6(%arg0: i32) -> (i32, i32) {
    %c0_i32 = arith.constant 0 : i32
    %c0_i32_0 = arith.constant 0 : i32
    %c0_i32_1 = arith.constant 0 : i32
    return %c0_i32, %c0_i32_0 : i32, i32
  }
  func.func @transform_7(%arg0: i32) -> (i32, i32) {
    %c0_i32 = arith.constant 0 : i32
    %c0_i32_0 = arith.constant 0 : i32
    return %arg0, %c0_i32 : i32, i32
  }
}

</mosaic_0001>

<bundles_post_ra>
// kernel: tpu_custom_call.1
= control target key start
LH: loop header
LB: loop body
LE: loop exit
PB: predicated region body
PF: predicated region fallthrough
CT: control target
= control target key end

     0   :  { %12 = vsyncpa [#allocation3], 0  ;;  %s605_s0 = inlined_call_operand.vmem [shape: f32[16,8], index: 0, kind: input, shape index: {}]   ;;  %s606_s1 = inlined_call_operand.vmem [shape: bf16[8,128], index: 1, kind: input, shape index: {}]   ;;  %s607_s2 = inlined_call_operand.vmem [shape: f32[1,128], index: 2, kind: input, shape index: {}]   ;;  %s608_s3 = inlined_call_operand.hbm [shape: bf16[128,128], index: 3, kind: input, shape index: {}]   ;;  %s609_s4 = inlined_call_operand.vmem [shape: f32[1,128], index: 4, kind: input, shape index: {}]   ;;  %s610_s5 = inlined_call_operand.hbm [shape: bf16[128,128], index: 5, kind: input, shape index: {}]   ;;  %s611_s6 = inlined_call_operand.vmem [shape: f32[1,128], index: 6, kind: input, shape index: {}]   ;;  %s612_s7 = inlined_call_operand.vmem [shape: f32[16,4], index: 7, kind: output, shape index: {}]  }
   0x1   :  { %13 = vsyncpa [#allocation5], 0  ;;  %s506_s24 = smov [#allocation2]  }
   0x2   :  { %s25_s25 = sshll.u32 %s506_s24, 4  ;;  %s26_s25 = int_to_ptr.vmem [resolvable:$true] %s25_s25 }
   0x3   :  { %s470_s26 = scalar_lea.vmem %s26_s25, 1024  ;;  %p475_p1 = scmp.lt.s32.totalorder %s26_s25, %s26_s25 }
   0x4   :  { %p471_p0 = scmp.ne.s32.totalorder %s26_s25, %s470_s26  ;;  %p476_p2 = scmp.lt.s32.totalorder %s470_s26, %s470_s26 }
   0x6   :  { %p477_p3 = por %p476_p2, %p475_p1 }
   0x8   :  { %p478_p4 = pnand %p477_p3, %p471_p0 }
   0xa   :  { %481 = shalt.err (!%p478_p4)
}
   0xb   :  { %s507_s27 = smov 64   ;;  %s508_s28 = smov 4  }
   0xc   :  { %31 = dma.hbm_to_vmem [thread:$0]  %s608_s3, 1024, %s26_s25, [#allocation3], %s507_s27, %s507_s27, %s508_s28  }
   0xd   :  { %s509_s8 = smov [#allocation4]  }
   0xe   :  { %s39_s9 = sshll.u32 %s509_s8, 4  ;;  %s40_s9 = int_to_ptr.vmem [resolvable:$true] %s39_s9 }
   0xf   :  { %s490_s10 = scalar_lea.vmem %s40_s9, 1024  ;;  %p495_p6 = scmp.lt.s32.totalorder %s40_s9, %s40_s9 }
  0x10   :  { %p491_p5 = scmp.ne.s32.totalorder %s40_s9, %s490_s10  ;;  %p496_p7 = scmp.lt.s32.totalorder %s490_s10, %s490_s10 }
  0x12   :  { %p497_p8 = por %p496_p7, %p495_p6 }
  0x14   :  { %p498_p9 = pnand %p497_p8, %p491_p5 }
  0x16   :  { %501 = shalt.err (!%p498_p9)
}
  0x17   :  { %45 = dma.hbm_to_vmem [thread:$0]  %s610_s5, 1024, %s40_s9, [#allocation5], %s507_s27, %s507_s27, %s508_s28  }
  0x18   :  { %502 = dma.done.wait [#allocation3], 1024  }
  0x19   :  { %503 = vsyncadd [#allocation3], 4294966272 }
  0x1a   :  { %504 = dma.done.wait [#allocation5], 1024  }
  0x1b   :  { %505 = vsyncadd [#allocation5], 4294966272  ;;  %v510_v0 = vmov 0.0   ;;  %vm511_vm0 = vmmov 0   ;;  %vm70_vm1 = vcmask 1043456   ;;  %v55_v2 = vld [vmem:[%s605_s0] sm:$0xff] }
  0x1c   :  { %394 = vmatprep.subr.bf16.mxu0 %v510_v0  ;;  %396 = vmatprep.mubr.msk.bf16.mxu0 %vm511_vm0, %v510_v0  ;;  %v58_v1 = vld [vmem:[%s606_s1] sm:$0xf]  ;;  %v56_v3 = vld [vmem:[%s605_s0 + $0x8] sm:$0xff]  ;;  %v446_v6 = vld [vmem:[#allocation2 + $0x38] sm:$0xff]   ;;  %vm66_vm2 = vcmask 64512   ;;  %vm345_vm3 = vcmask 31744  }
  0x1d   :  { %400 = vmatprep.subr.bf16.mxu1 %v510_v0  ;;  %416 = vmatprep.mubr.msk.bf16.mxu1 %vm511_vm0, %v510_v0  ;;  %v72_v4 = vsel %vm70_vm1, %v58_v1, 0  ;;  %v57_v5 = vpack.c.bf16 %v56_v3, %v55_v2  ;;  %v447_v7 = vld [vmem:[#allocation2 + $0x30] sm:$0xff]   ;;  %v448_v8 = vld [vmem:[#allocation2 + $0x28] sm:$0xff]   ;;  %v449_v9 = vld [vmem:[#allocation2 + $0x20] sm:$0xff]  }
  0x1e   :  { %395 = vmatpush3.bf16.msra.mxu0 %v72_v4  ;;  %401 = vmatpush3.bf16.msra.mxu1 %v446_v6  ;;  %v450_v10 = vld [vmem:[#allocation2 + $0x18] sm:$0xff]   ;;  %v451_v11 = vld [vmem:[#allocation2 + $0x10] sm:$0xff]   ;;  %v452_v12 = vld [vmem:[#allocation2 + $0x8] sm:$0xff]  }
  0x1f   :  { %420 = vmatprep.subr.bf16.mxu0 %v510_v0  ;;  %402 = vmatprep.subr.bf16.mxu1 %v510_v0  ;;  %v453_v13 = vld [vmem:[#allocation2] sm:$0xff]   ;;  %v454_v14 = vld [vmem:[#allocation4 + $0x38] sm:$0xff]   ;;  %v455_v15 = vld [vmem:[#allocation4 + $0x30] sm:$0xff]  }
  0x20   :  { %v456_v16 = vld [vmem:[#allocation4 + $0x28] sm:$0xff]   ;;  %v457_v17 = vld [vmem:[#allocation4 + $0x20] sm:$0xff]   ;;  %v458_v18 = vld [vmem:[#allocation4 + $0x18] sm:$0xff]  }
  0x21   :  { %397 = vmatmul.mubr.msk.bf16.vlgmr.msra.gmra.mxu0 %vm66_vm2, %v57_v5  ;;  %v354_v19 = vld [vmem:[%s607_s2] ss:$0 sm:$0xff]  ;;  %v459_v29 = vld [vmem:[#allocation4 + $0x10] sm:$0xff]   ;;  %v460_v30 = vld [vmem:[#allocation4 + $0x8] sm:$0xff]  }
  0x22   :  { %436 = vmatprep.mubr.msk.bf16.mxu0 %vm511_vm0, %v510_v0  ;;  %403 = vmatpush3.bf16.msra.mxu1 %v447_v7  ;;  %v461_v31 = vld [vmem:[#allocation4] sm:$0xff]  }
  0x23   :  { %404 = vmatprep.subr.bf16.mxu1 %v510_v0  ;;  %421 = vmatpush3.bf16.msra.mxu0 %v454_v14  ;;  %v356_v32 = vld [vmem:[%s609_s4] ss:$0 sm:$0xff] }
  0x24   :  { %422 = vmatprep.subr.bf16.mxu0 %v510_v0  ;;  %v365_v42 = vld [vmem:[%s611_s6] ss:$0 sm:$0xff] }
  0x26   :  { %405 = vmatpush3.bf16.msra.mxu1 %v448_v8 }
  0x27   :  { %406 = vmatprep.subr.bf16.mxu1 %v510_v0  ;;  %423 = vmatpush3.bf16.msra.mxu0 %v455_v15 }
  0x28   :  { %424 = vmatprep.subr.bf16.mxu0 %v510_v0 }
  0x2a   :  { %407 = vmatpush3.bf16.msra.mxu1 %v449_v9 }
  0x2b   :  { %408 = vmatprep.subr.bf16.mxu1 %v510_v0  ;;  %425 = vmatpush3.bf16.msra.mxu0 %v456_v16 }
  0x2c   :  { %426 = vmatprep.subr.bf16.mxu0 %v510_v0 }
  0x2e   :  { %409 = vmatpush3.bf16.msra.mxu1 %v450_v10 }
  0x2f   :  { %410 = vmatprep.subr.bf16.mxu1 %v510_v0  ;;  %427 = vmatpush3.bf16.msra.mxu0 %v457_v17 }
  0x30   :  { %428 = vmatprep.subr.bf16.mxu0 %v510_v0 }
  0x32   :  { %411 = vmatpush3.bf16.msra.mxu1 %v451_v11 }
  0x33   :  { %412 = vmatprep.subr.bf16.mxu1 %v510_v0  ;;  %429 = vmatpush3.bf16.msra.mxu0 %v458_v18 }
  0x34   :  { %430 = vmatprep.subr.bf16.mxu0 %v510_v0 }
  0x36   :  { %413 = vmatpush3.bf16.msra.mxu1 %v452_v12 }
  0x37   :  { %414 = vmatprep.subr.bf16.mxu1 %v510_v0  ;;  %431 = vmatpush3.bf16.msra.mxu0 %v459_v29 }
  0x38   :  { %432 = vmatprep.subr.bf16.mxu0 %v510_v0 }
  0x3a   :  { %415 = vmatpush3.bf16.msra.mxu1 %v453_v13 }
  0x3b   :  { %433 = vmatpush3.bf16.msra.mxu0 %v460_v30 }
  0x3c   :  { %434 = vmatprep.subr.bf16.mxu0 %v510_v0 }
  0x3f   :  { %435 = vmatpush3.bf16.msra.mxu0 %v461_v31 }
  0xe1   :  { %v108_v20 = vpop.f32.mrf.mxu0 }
  0xe2   :  { %v109_v22 = vadd.f32 %v354_v19, %v108_v20 }
  0xe3   :  { %v398_v21 = vpop.f32.mrf.mxu0 }
  0xe4   :  { %v115_v26 = vmax.f32 %v109_v22, 0.0 }
  0xe5   :  { %v111_v23 = vpop.f32.mrf.mxu0 }
  0xe6   :  { %v112_v24 = vadd.f32 %v354_v19, %v111_v23 }
  0xe7   :  { %v399_v25 = vpop.f32.mrf.mxu0 }
  0xe8   :  { %v116_v27 = vmax.f32 %v112_v24, 0.0 }
  0xea   :  { %v117_v28 = vpack.c.bf16 %v116_v27, %v115_v26 }
  0xec   :  { %417 = vmatmul.mubr.bf16.vlgmr.msra.gmra.mxu1 %v117_v28 }
 0x1ac   :  { %v223_v33 = vpop.f32.mrf.mxu1 }
 0x1ad   :  { %v224_v35 = vadd.f32 %v356_v32, %v223_v33 }
 0x1ae   :  { %v418_v34 = vpop.f32.mrf.mxu1 }
 0x1af   :  { %v230_v39 = vmax.f32 %v224_v35, 0.0 }
 0x1b0   :  { %v226_v36 = vpop.f32.mrf.mxu1 }
 0x1b1   :  { %v227_v37 = vadd.f32 %v356_v32, %v226_v36 }
 0x1b2   :  { %v419_v38 = vpop.f32.mrf.mxu1 }
 0x1b3   :  { %v231_v40 = vmax.f32 %v227_v37, 0.0 }
 0x1b5   :  { %v232_v41 = vpack.c.bf16 %v231_v40, %v230_v39 }
 0x1b7   :  { %437 = vmatmul.mubr.bf16.vlgmr.msra.gmra.mxu0 %v232_v41 }
 0x277   :  { %v338_v43 = vpop.f32.mrf.mxu0 }
 0x278   :  { %v339_v44 = vadd.f32 %v365_v42, %v338_v43 }
 0x279   :  { %v438_v45 = vpop.f32.mrf.mxu0 }
 0x27a   :  { %346 = vst.msk [vmem:[%s612_s7] sm:$0xff] %vm345_vm3, %v339_v44 }
 0x27b   :  { %v341_v46 = vpop.f32.mrf.mxu0 }
 0x27c   :  { %v342_v47 = vadd.f32 %v365_v42, %v341_v46 }
 0x27d   :  { %v439_v48 = vpop.f32.mrf.mxu0 }
 0x27e   :  { %347 = vst.msk [vmem:[%s612_s7 + $0x8] sm:$0xff] %vm345_vm3, %v342_v47 }
 0x27f   :  { %352 = vsyncpa [#allocation3], 1 }
 0x280   :  { %353 = vsyncpa [#allocation5], 1 }

</bundles_post_ra>
